<compile_context>
chip_gen: v7x
topology: tpu7x:2x2x1
jax: 0.10.0
libtpu: 0.0.40
codegen_flags: <defaults>
</compile_context>

<pallas_src>
import jax
import jax.numpy as jnp
from jax.experimental import pallas as pl
from jax.experimental.pallas import tpu as pltpu

INPUT_SIZE = 784        # 28 * 28
HIDDEN_SIZE = 128
NUM_CLASSES = 10
N_PAD = 128             # padded class dim: lane-dense, unmasked output store
MAX_TILE_B = 1024       # batch rows per grid step (~8 MiB live VMEM at f32 x)
MIN_SPLIT_B = 16        # below this, a single full-batch block is cheapest


def _round_up(x, m):
    return (x + m - 1) // m * m


def _choose_tile_b(batch):
    """Pick the batch tile (rows per grid step).

    Goals: tile rows multiple of 8 (f32 sublane) unless a single block covers
    the whole batch; >= 2 grid steps when there is enough work (so v7x's two
    TensorCores both run under dimension_semantics=('parallel',)); prefer a
    tile that divides the batch exactly (no wrapper padding, no partial
    blocks); tile <= MAX_TILE_B.
    """
    if batch < MIN_SPLIT_B:
        return batch                              # one full-batch block
    min_steps = max(2, -(-batch // MAX_TILE_B))   # >=2 steps -> both v7x TCs
    if batch % 8 == 0:
        groups = batch // 8                       # 8-row sublane groups
        for steps in range(min_steps, min(min_steps + 8, groups) + 1):
            if groups % steps == 0:               # tile divides batch exactly
                return (groups // steps) * 8
    # Awkward batch: 8-aligned tile; the final block is partial (Pallas masks
    # the out-of-range rows on store, the dead rows' compute is discarded).
    return min(MAX_TILE_B, _round_up(-(-batch // min_steps), 8))


def mlp_kernel(x_ref, w1_ref, b1_ref, w2_ref, b2_ref, o_ref):
    # Raw f32 x tile straight from HBM; cast to bf16 in-kernel (VPU slack).
    x = x_ref[...].astype(jnp.bfloat16)
    # Hidden layer: (TB, 784)bf16 @ (784, 128)bf16 -> f32 accumulate on MXU.
    h = jnp.dot(x, w1_ref[...], preferred_element_type=jnp.float32)
    h = jnp.maximum(h + b1_ref[...], 0.0)                 # bias + ReLU in f32
    # Output layer: (TB, 128)bf16 @ (128, 128)bf16 -> f32 accumulate on MXU.
    out = jnp.dot(h.astype(jnp.bfloat16), w2_ref[...],
                  preferred_element_type=jnp.float32)
    o_ref[...] = (out + b2_ref[...]).astype(o_ref.dtype)  # dense 128-wide store


def prepare_params(w1, b1, w2, b2):
    """One-time prep of weights into the kernel-friendly layout.

    Args:
      w1: (784, 128) first linear weight (transposed vs torch layout).
      b1: (128,)     first linear bias.
      w2: (128, 10)  second linear weight (transposed vs torch layout).
      b2: (10,)      second linear bias.
    """
    w1p = w1.astype(jnp.bfloat16)                          # (784, 128), no K pad
    b1p = b1.reshape(1, HIDDEN_SIZE).astype(jnp.float32)
    w2p = jnp.zeros((HIDDEN_SIZE, N_PAD), jnp.float32)
    w2p = w2p.at[:, :NUM_CLASSES].set(w2.astype(jnp.float32)).astype(jnp.bfloat16)
    b2p = jnp.zeros((1, N_PAD), jnp.float32)
    b2p = b2p.at[0, :NUM_CLASSES].set(b2.astype(jnp.float32))
    return w1p, b1p, w2p, b2p


@jax.jit
def mnist_classifier_forward(x_nchw, w1p, b1p, w2p, b2p):
    """Forward pass matching MNISTClassifier.forward.

    Args:
      x_nchw: (B, 1, 28, 28) float32 input images (NCHW, like torch).
      w1p, b1p, w2p, b2p: outputs of prepare_params.

    Returns:
      (B, 10) float32 logits.
    """
    batch = x_nchw.shape[0]
    tile_b = _choose_tile_b(batch)
    n_steps = -(-batch // tile_b)

    # Pure reshape -- no pad, no cast: x goes to the kernel as raw f32.
    x = x_nchw.reshape(batch, -1).astype(jnp.float32)

    out = pl.pallas_call(
        mlp_kernel,
        out_shape=jax.ShapeDtypeStruct((batch, N_PAD), jnp.float32),
        grid_spec=pltpu.PrefetchScalarGridSpec(
            num_scalar_prefetch=0,
            grid=(n_steps,),
            in_specs=[
                pl.BlockSpec((tile_b, INPUT_SIZE), lambda i: (i, 0)),       # x tile
                pl.BlockSpec((INPUT_SIZE, HIDDEN_SIZE), lambda i: (0, 0)),  # w1 (resident)
                pl.BlockSpec((1, HIDDEN_SIZE), lambda i: (0, 0)),           # b1 (resident)
                pl.BlockSpec((HIDDEN_SIZE, N_PAD), lambda i: (0, 0)),       # w2 (resident)
                pl.BlockSpec((1, N_PAD), lambda i: (0, 0)),                 # b2 (resident)
            ],
            out_specs=pl.BlockSpec((tile_b, N_PAD), lambda i: (i, 0)),
        ),
        compiler_params=pltpu.CompilerParams(
            dimension_semantics=("parallel",),       # megacore sharding on v7x
            vmem_limit_bytes=32 * 1024 * 1024,       # explicit budget (v5e default is 16 MiB)
        ),
    )(x, w1p, b1p, w2p, b2p)

    return out[:, :NUM_CLASSES]


def init_params(key, input_size=INPUT_SIZE, hidden_size=HIDDEN_SIZE,
                num_classes=NUM_CLASSES):
    """Deterministic init mimicking torch.nn.Linear default U(-1/sqrt(fan_in), +)."""
    k1, k2, k3, k4 = jax.random.split(key, 4)
    bound1 = 1.0 / jnp.sqrt(input_size)
    bound2 = 1.0 / jnp.sqrt(hidden_size)
    w1 = jax.random.uniform(k1, (input_size, hidden_size), jnp.float32,
                            -bound1, bound1)
    b1 = jax.random.uniform(k2, (hidden_size,), jnp.float32, -bound1, bound1)
    w2 = jax.random.uniform(k3, (hidden_size, num_classes), jnp.float32,
                            -bound2, bound2)
    b2 = jax.random.uniform(k4, (num_classes,), jnp.float32, -bound2, bound2)
    return w1, b1, w2, b2


if __name__ == "__main__":
    key = jax.random.PRNGKey(0)
    k_x, k_p = jax.random.split(key)

    w1, b1, w2, b2 = init_params(k_p)
    params = prepare_params(w1, b1, w2, b2)   # one-time, outside the hot path

    def ref_bf16(xb):
        xf = xb.reshape(xb.shape[0], -1)
        h = jnp.maximum(
            jnp.dot(xf.astype(jnp.bfloat16), w1.astype(jnp.bfloat16),
                    preferred_element_type=jnp.float32) + b1, 0.0)
        return jnp.dot(h.astype(jnp.bfloat16), w2.astype(jnp.bfloat16),
                       preferred_element_type=jnp.float32) + b2

    def ref_f32(xb):
        xf = xb.reshape(xb.shape[0], -1)
        return jnp.maximum(xf @ w1 + b1, 0.0) @ w2 + b2

    # B=8 exercises the single-full-block path; B=32 exercises the 2-step
    # batch grid (tile_b=16, all blocks full, 'parallel' across v7x cores).
    for B in (8, 32):
        x = jax.random.normal(jax.random.fold_in(k_x, B),
                              (B, 1, 28, 28), jnp.float32)
        logits = jax.block_until_ready(mnist_classifier_forward(x, *params))
        assert logits.shape == (B, NUM_CLASSES)

        # Tight check against a reference using the same bf16 operand rounding.
        assert jnp.allclose(logits, ref_bf16(x), atol=2e-3, rtol=2e-3)
        # Looser sanity check against the pure-f32 torch-equivalent reference
        # (bf16 matmul operands cost ~1e-2 abs on the logits).
        assert jnp.allclose(logits, ref_f32(x), atol=5e-2, rtol=5e-2)

    # TODO(synk): training utilities (CrossEntropyLoss, Adam, train/eval loops,
    # save/load) are host-side and not part of the forward-pass kernel.
    print("KERNEL_OK")
</pallas_src>

<mosaic_0001>
module attributes {stable_mosaic.version = 11 : i64} {
  func.func @mlp_kernel(%arg0: i32, %arg1: memref<8x784xf32, #tpu.memory_space<vmem>>, %arg2: memref<784x128xbf16, #tpu.memory_space<vmem>>, %arg3: memref<1x128xf32, #tpu.memory_space<vmem>>, %arg4: memref<128x128xbf16, #tpu.memory_space<vmem>>, %arg5: memref<1x128xf32, #tpu.memory_space<vmem>>, %arg6: memref<8x128xf32, #tpu.memory_space<vmem>>) attributes {dimension_semantics = [#tpu.dimension_semantics<parallel>], iteration_bounds = array<i64: 1>, scalar_prefetch = 0 : i64, scratch_operands = 0 : i64, tpu.core_type = #tpu.core_type<tc>, window_params = [{transform_indices = @transform_0, window_bounds = array<i64: 8, 784>}, {pipeline_mode = #tpu.pipeline_mode<synchronous>, transform_indices = @transform_1, window_bounds = array<i64: 784, 128>}, {pipeline_mode = #tpu.pipeline_mode<synchronous>, transform_indices = @transform_2, window_bounds = array<i64: 1, 128>}, {pipeline_mode = #tpu.pipeline_mode<synchronous>, transform_indices = @transform_3, window_bounds = array<i64: 128, 128>}, {pipeline_mode = #tpu.pipeline_mode<synchronous>, transform_indices = @transform_4, window_bounds = array<i64: 1, 128>}, {transform_indices = @transform_5, window_bounds = array<i64: 8, 128>}]} {
    %c0 = arith.constant 0 : index
    %c0_0 = arith.constant 0 : index
    %0 = vector.load %arg1[%c0, %c0_0] : memref<8x784xf32, #tpu.memory_space<vmem>>, vector<8x784xf32>
    %1 = arith.truncf %0 : vector<8x784xf32> to vector<8x784xbf16>
    %c0_1 = arith.constant 0 : index
    %c0_2 = arith.constant 0 : index
    %2 = vector.load %arg2[%c0_1, %c0_2] : memref<784x128xbf16, #tpu.memory_space<vmem>>, vector<784x128xbf16>
    %cst = arith.constant dense<0.000000e+00> : vector<8x128xf32>
    %3 = tpu.matmul %1, %2, %cst {dimension_numbers = #tpu.dot_dimension_numbers<[1], [0], [0], [1], [0, 0, 1, 1], [], []>} : vector<8x784xbf16>, vector<784x128xbf16>, vector<8x128xf32> -> vector<8x128xf32>
    %c0_3 = arith.constant 0 : index
    %c0_4 = arith.constant 0 : index
    %4 = vector.load %arg3[%c0_3, %c0_4] : memref<1x128xf32, #tpu.memory_space<vmem>>, vector<1x128xf32>
    %5 = vector.broadcast %4 : vector<1x128xf32> to vector<8x128xf32>
    %6 = arith.addf %3, %5 : vector<8x128xf32>
    %cst_5 = arith.constant 0.000000e+00 : f32
    %7 = vector.broadcast %cst_5 : f32 to vector<8x128xf32>
    %8 = arith.maximumf %6, %7 : vector<8x128xf32>
    %9 = arith.truncf %8 : vector<8x128xf32> to vector<8x128xbf16>
    %c0_6 = arith.constant 0 : index
    %c0_7 = arith.constant 0 : index
    %10 = vector.load %arg4[%c0_6, %c0_7] : memref<128x128xbf16, #tpu.memory_space<vmem>>, vector<128x128xbf16>
    %cst_8 = arith.constant dense<0.000000e+00> : vector<8x128xf32>
    %11 = tpu.matmul %9, %10, %cst_8 {dimension_numbers = #tpu.dot_dimension_numbers<[1], [0], [0], [1], [0, 0, 1, 1], [], []>} : vector<8x128xbf16>, vector<128x128xbf16>, vector<8x128xf32> -> vector<8x128xf32>
    %c0_9 = arith.constant 0 : index
    %c0_10 = arith.constant 0 : index
    %12 = vector.load %arg5[%c0_9, %c0_10] : memref<1x128xf32, #tpu.memory_space<vmem>>, vector<1x128xf32>
    %13 = vector.broadcast %12 : vector<1x128xf32> to vector<8x128xf32>
    %14 = arith.addf %11, %13 : vector<8x128xf32>
    %c0_11 = arith.constant 0 : index
    %c0_12 = arith.constant 0 : index
    %15 = vector.load %arg6[%c0_11, %c0_12] : memref<8x128xf32, #tpu.memory_space<vmem>>, vector<8x128xf32>
    tpu.vector_store %arg6[%c0_11, %c0_12], %14 {strides = array<i32>} : memref<8x128xf32, #tpu.memory_space<vmem>>, vector<8x128xf32>,
    return
  }
  func.func @transform_0(%arg0: i32) -> (i32, i32) {
    %c0_i32 = arith.constant 0 : i32
    %c0_i32_0 = arith.constant 0 : i32
    return %arg0, %c0_i32 : i32, i32
  }
  func.func @transform_1(%arg0: i32) -> (i32, i32) {
    %c0_i32 = arith.constant 0 : i32
    %c0_i32_0 = arith.constant 0 : i32
    %c0_i32_1 = arith.constant 0 : i32
    return %c0_i32, %c0_i32_0 : i32, i32
  }
  func.func @transform_2(%arg0: i32) -> (i32, i32) {
    %c0_i32 = arith.constant 0 : i32
    %c0_i32_0 = arith.constant 0 : i32
    %c0_i32_1 = arith.constant 0 : i32
    return %c0_i32, %c0_i32_0 : i32, i32
  }
  func.func @transform_3(%arg0: i32) -> (i32, i32) {
    %c0_i32 = arith.constant 0 : i32
    %c0_i32_0 = arith.constant 0 : i32
    %c0_i32_1 = arith.constant 0 : i32
    return %c0_i32, %c0_i32_0 : i32, i32
  }
  func.func @transform_4(%arg0: i32) -> (i32, i32) {
    %c0_i32 = arith.constant 0 : i32
    %c0_i32_0 = arith.constant 0 : i32
    %c0_i32_1 = arith.constant 0 : i32
    return %c0_i32, %c0_i32_0 : i32, i32
  }
  func.func @transform_5(%arg0: i32) -> (i32, i32) {
    %c0_i32 = arith.constant 0 : i32
    %c0_i32_0 = arith.constant 0 : i32
    return %arg0, %c0_i32 : i32, i32
  }
}

</mosaic_0001>

<bundles_post_ra>
// kernel: mnist_classifier_forward.1
= control target key start
LH: loop header
LB: loop body
LE: loop exit
PB: predicated region body
PF: predicated region fallthrough
CT: control target
= control target key end

     0   :  { %v974_v44 = vmov 0.0   ;;  %vm975_vm0 = vmmov 0   ;;  %vm435_vm1 = vcmask 130048   ;;  %s1230_s0 = inlined_call_operand.vmem [shape: f32[8,784], index: 0, kind: input, shape index: {}]   ;;  %s1231_s1 = inlined_call_operand.vmem [shape: bf16[784,128], index: 1, kind: input, shape index: {}]   ;;  %s1232_s2 = inlined_call_operand.vmem [shape: f32[1,128], index: 2, kind: input, shape index: {}]   ;;  %s1233_s3 = inlined_call_operand.vmem [shape: bf16[128,128], index: 3, kind: input, shape index: {}]   ;;  %s1234_s4 = inlined_call_operand.vmem [shape: f32[1,128], index: 4, kind: input, shape index: {}]   ;;  %s1235_s5 = inlined_call_operand.hbm [shape: f32[8,128], index: 5, kind: output, shape index: {}]  }
   0x1   :  { %v893_v0 = vld [vmem:[%s1231_s1 + $0x40] sm:$0xff]   ;;  %v897_v4 = vld [vmem:[%s1231_s1 + $0x48] sm:$0xff]   ;;  %v901_v8 = vld [vmem:[%s1231_s1 + $0x50] sm:$0xff]  }
   0x2   :  { %v894_v1 = vld [vmem:[%s1231_s1] sm:$0xff]   ;;  %787 = vmatprep.subr.bf16.mxu0 %v893_v0  ;;  %v898_v5 = vld [vmem:[%s1231_s1 + $0x8] sm:$0xff]   ;;  %v902_v9 = vld [vmem:[%s1231_s1 + $0x10] sm:$0xff]  }
   0x3   :  { %v895_v2 = vld [vmem:[%s1231_s1 + $0xc0] sm:$0xff]   ;;  %788 = vmatpush3.bf16.msra.mxu0 %v894_v1  ;;  %v899_v6 = vld [vmem:[%s1231_s1 + $0xc8] sm:$0xff]   ;;  %v903_v10 = vld [vmem:[%s1231_s1 + $0xd0] sm:$0xff]  }
   0x4   :  { %v896_v3 = vld [vmem:[%s1231_s1 + $0x80] sm:$0xff]   ;;  %809 = vmatprep.subr.bf16.mxu1 %v895_v2  ;;  %789 = vmatprep.subr.bf16.mxu0 %v897_v4  ;;  %v900_v7 = vld [vmem:[%s1231_s1 + $0x88] sm:$0xff]   ;;  %v904_v11 = vld [vmem:[%s1231_s1 + $0x90] sm:$0xff]  }
   0x5   :  { %810 = vmatpush3.bf16.msra.mxu1 %v896_v3  ;;  %v905_v12 = vld [vmem:[%s1231_s1 + $0x58] sm:$0xff]   ;;  %v909_v16 = vld [vmem:[%s1231_s1 + $0x60] sm:$0xff]   ;;  %v913_v20 = vld [vmem:[%s1231_s1 + $0x68] sm:$0xff]  }
   0x6   :  { %811 = vmatprep.subr.bf16.mxu1 %v899_v6  ;;  %v906_v13 = vld [vmem:[%s1231_s1 + $0x18] sm:$0xff]   ;;  %v910_v17 = vld [vmem:[%s1231_s1 + $0x20] sm:$0xff]   ;;  %v914_v21 = vld [vmem:[%s1231_s1 + $0x28] sm:$0xff]  }
   0x7   :  { %790 = vmatpush3.bf16.msra.mxu0 %v898_v5  ;;  %v907_v14 = vld [vmem:[%s1231_s1 + $0xd8] sm:$0xff]   ;;  %v911_v18 = vld [vmem:[%s1231_s1 + $0xe0] sm:$0xff]   ;;  %v915_v22 = vld [vmem:[%s1231_s1 + $0xe8] sm:$0xff]  }
   0x8   :  { %791 = vmatprep.subr.bf16.mxu0 %v901_v8  ;;  %v908_v15 = vld [vmem:[%s1231_s1 + $0x98] sm:$0xff]   ;;  %v912_v19 = vld [vmem:[%s1231_s1 + $0xa0] sm:$0xff]   ;;  %v916_v23 = vld [vmem:[%s1231_s1 + $0xa8] sm:$0xff]  }
   0x9   :  { %812 = vmatpush3.bf16.msra.mxu1 %v900_v7  ;;  %v917_v24 = vld [vmem:[%s1231_s1 + $0x70] sm:$0xff]   ;;  %v921_v28 = vld [vmem:[%s1231_s1 + $0x78] sm:$0xff]   ;;  %v23_v31 = vld [vmem:[%s1230_s0 + $0x8] sm:$0xff] }
   0xa   :  { %813 = vmatprep.subr.bf16.mxu1 %v903_v10  ;;  %v918_v25 = vld [vmem:[%s1231_s1 + $0x30] sm:$0xff]   ;;  %v922_v29 = vld [vmem:[%s1231_s1 + $0x38] sm:$0xff]   ;;  %v30_v32 = vpack.c.bf16 %v23_v31, %v23_v31  ;;  %v22_v34 = vld [vmem:[%s1230_s0] sm:$0xff] }
   0xb   :  { %792 = vmatpush3.bf16.msra.mxu0 %v902_v9  ;;  %v919_v26 = vld [vmem:[%s1231_s1 + $0xf0] sm:$0xff]   ;;  %v923_v30 = vld [vmem:[%s1231_s1 + $0xf8] sm:$0xff]   ;;  %v29_v35 = vpack.c.bf16 %v22_v34, %v22_v34  ;;  %v925_v36 = vld [vmem:[%s1231_s1 + $0x140] sm:$0xff]  }
   0xc   :  { %793 = vmatprep.subr.bf16.mxu0 %v905_v12  ;;  %v920_v27 = vld [vmem:[%s1231_s1 + $0xb0] sm:$0xff]   ;;  %v924_v33 = vld [vmem:[%s1231_s1 + $0xb8] sm:$0xff]   ;;  %471 = vmatprep.mubr.bf16.mxu0 %v30_v32  ;;  %v926_v39 = vld [vmem:[%s1231_s1 + $0x100] sm:$0xff]  }
   0xd   :  { %814 = vmatpush3.bf16.msra.mxu1 %v904_v11  ;;  %v25_v37 = vld [vmem:[%s1230_s0 + $0x18] sm:$0xff]  ;;  %v24_v40 = vld [vmem:[%s1230_s0 + $0x10] sm:$0xff]  ;;  %v927_v42 = vld [vmem:[%s1231_s1 + $0x148] sm:$0xff]  }
   0xe   :  { %815 = vmatprep.subr.bf16.mxu1 %v907_v14  ;;  %v32_v38 = vpack.c.bf16 %v25_v37, %v25_v37  ;;  %v31_v41 = vpack.c.bf16 %v24_v40, %v24_v40  ;;  %v928_v43 = vld [vmem:[%s1231_s1 + $0x108] sm:$0xff]   ;;  %v929_v45 = vld [vmem:[%s1231_s1 + $0x150] sm:$0xff]   ;;  %v931_v47 = vld [vmem:[%s1231_s1 + $0x158] sm:$0xff]  }
   0xf   :  { %794 = vmatpush3.bf16.msra.mxu0 %v906_v13  ;;  %v930_v46 = vld [vmem:[%s1231_s1 + $0x110] sm:$0xff]   ;;  %v932_v48 = vld [vmem:[%s1231_s1 + $0x118] sm:$0xff]   ;;  %v933_v49 = vld [vmem:[%s1231_s1 + $0x160] sm:$0xff]  }
  0x10   :  { %795 = vmatprep.subr.bf16.mxu0 %v909_v16  ;;  %511 = vmatprep.mubr.bf16.mxu1 %v32_v38  ;;  %v934_v50 = vld [vmem:[%s1231_s1 + $0x120] sm:$0xff]   ;;  %v935_v51 = vld [vmem:[%s1231_s1 + $0x168] sm:$0xff]   ;;  %v937_v55 = vld [vmem:[%s1231_s1 + $0x170] sm:$0xff]  }
  0x11   :  { %816 = vmatpush3.bf16.msra.mxu1 %v908_v15  ;;  %v936_v52 = vld [vmem:[%s1231_s1 + $0x128] sm:$0xff]   ;;  %v941_v53 = vld [vmem:[%s1231_s1 + $0x180] sm:$0xff]   ;;  %v28_v57 = vld [vmem:[%s1230_s0 + $0x30] sm:$0xff] }
  0x12   :  { %817 = vmatprep.subr.bf16.mxu1 %v911_v18  ;;  %v27_v54 = vld [vmem:[%s1230_s0 + $0x28] sm:$0xff]  ;;  %v35_v58 = vpack.c.bf16 %v28_v57, %v28_v57  ;;  %v938_v59 = vld [vmem:[%s1231_s1 + $0x130] sm:$0xff]  }
  0x13   :  { %796 = vmatpush3.bf16.msra.mxu0 %v910_v17  ;;  %v34_v56 = vpack.c.bf16 %v27_v54, %v27_v54 }
  0x14   :  { %797 = vmatprep.subr.bf16.mxu0 %v913_v20 }
  0x15   :  { %818 = vmatpush3.bf16.msra.mxu1 %v912_v19 }
  0x16   :  { %819 = vmatprep.subr.bf16.mxu1 %v915_v22 }
  0x17   :  { %798 = vmatpush3.bf16.msra.mxu0 %v914_v21 }
  0x18   :  { %799 = vmatprep.subr.bf16.mxu0 %v917_v24 }
  0x19   :  { %820 = vmatpush3.bf16.msra.mxu1 %v916_v23 }
  0x1a   :  { %821 = vmatprep.subr.bf16.mxu1 %v919_v26 }
  0x1b   :  { %800 = vmatpush3.bf16.msra.mxu0 %v918_v25 }
  0x1c   :  { %801 = vmatprep.subr.bf16.mxu0 %v921_v28 }
  0x1d   :  { %822 = vmatpush3.bf16.msra.mxu1 %v920_v27 }
  0x1e   :  { %823 = vmatprep.subr.bf16.mxu1 %v923_v30 }
  0x1f   :  { %802 = vmatpush3.bf16.msra.mxu0 %v922_v29 }
  0x20   :  { %831 = vmatprep.subr.bf16.mxu0 %v925_v36 }
  0x21   :  { %824 = vmatpush3.bf16.msra.mxu1 %v924_v33 }
  0x22   :  { %472 = vmatmul.mubr.bf16.vlgmr.msra.gmra.mrb[0].mxu0 %v29_v35  ;;  %864 = vmatprep.subr.bf16.mxu1 %v974_v44 }
  0x23   :  { %832 = vmatpush3.bf16.msra.mxu0 %v926_v39  ;;  %551 = vmatprep.mubr.bf16.mxu0 %v34_v56 }
  0x24   :  { %512 = vmatmul.mubr.bf16.vlgmr.msra.gmra.mrb[0].mxu1 %v31_v41  ;;  %833 = vmatprep.subr.bf16.mxu0 %v927_v42 }
  0x25   :  { %866 = vmatprep.mubr.msk.bf16.mxu1 %vm975_vm0, %v974_v44  ;;  %865 = vmatpush3.bf16.msra.mxu1 %v941_v53 }
  0x26   :  { %870 = vmatprep.subr.bf16.mxu1 %v974_v44 }
  0x27   :  { %834 = vmatpush3.bf16.msra.mxu0 %v928_v43 }
  0x28   :  { %835 = vmatprep.subr.bf16.mxu0 %v929_v45 }
  0x2b   :  { %836 = vmatpush3.bf16.msra.mxu0 %v930_v46 }
  0x2c   :  { %837 = vmatprep.subr.bf16.mxu0 %v931_v47  ;;  %867 = vmatmul.mubr.msk.bf16.vlgmr.msra.gmra.mrb[4].mxu1 %vm435_vm1, %v35_v58 }
  0x2d   :  { %886 = vmatprep.mubr.msk.bf16.mxu1 %vm975_vm0, %v974_v44 }
  0x2f   :  { %838 = vmatpush3.bf16.msra.mxu0 %v932_v48 }
  0x30   :  { %839 = vmatprep.subr.bf16.mxu0 %v933_v49 }
  0x33   :  { %840 = vmatpush3.bf16.msra.mxu0 %v934_v50 }
  0x34   :  { %841 = vmatprep.subr.bf16.mxu0 %v935_v51 }
  0x37   :  { %842 = vmatpush3.bf16.msra.mxu0 %v936_v52 }
  0x38   :  { %10 = vsyncpa [#allocation3], 0  ;;  %843 = vmatprep.subr.bf16.mxu0 %v937_v55  ;;  %v939_v60 = vld [vmem:[%s1231_s1 + $0x178] sm:$0xff]   ;;  %v26_v62 = vld [vmem:[%s1230_s0 + $0x20] sm:$0xff]  ;;  %s976_s21 = smov [#allocation2]  }
  0x39   :  { %v940_v61 = vld [vmem:[%s1231_s1 + $0x138] sm:$0xff]   ;;  %v33_v63 = vpack.c.bf16 %v26_v62, %v26_v62  ;;  %v942_v0 = vld [vmem:[%s1233_s3] sm:$0xff]   ;;  %v943_v1 = vld [vmem:[%s1233_s3 + $0x8] sm:$0xff]   ;;  %s719_s22 = sshll.u32 %s976_s21, 4  ;;  %s720_s22 = int_to_ptr.vmem [resolvable:$true] %s719_s22 }
  0x3a   :  { %871 = vmatpush3.bf16.msra.mxu1 %v942_v0  ;;  %v944_v2 = vld [vmem:[%s1233_s3 + $0x10] sm:$0xff]   ;;  %v945_v3 = vld [vmem:[%s1233_s3 + $0x18] sm:$0xff]   ;;  %v946_v4 = vld [vmem:[%s1233_s3 + $0x20] sm:$0xff]   ;;  %s950_s23 = scalar_lea.vmem %s720_s22, 128  ;;  %p955_p1 = scmp.lt.s32.totalorder %s720_s22, %s720_s22 }
  0x3b   :  { %844 = vmatpush3.bf16.msra.mxu0 %v938_v59  ;;  %872 = vmatprep.subr.bf16.mxu1 %v974_v44  ;;  %v947_v5 = vld [vmem:[%s1233_s3 + $0x28] sm:$0xff]   ;;  %v948_v6 = vld [vmem:[%s1233_s3 + $0x30] sm:$0xff]   ;;  %v949_v7 = vld [vmem:[%s1233_s3 + $0x38] sm:$0xff]   ;;  %p951_p0 = scmp.ne.s32.totalorder %s720_s22, %s950_s23  ;;  %p956_p2 = scmp.lt.s32.totalorder %s950_s23, %s950_s23 }
  0x3c   :  { %845 = vmatprep.subr.bf16.mxu0 %v939_v60  ;;  %v727_v9 = vld [vmem:[%s1232_s2] ss:$0 sm:$0xff] }
  0x3d   :  { %v778_v34 = vld [vmem:[%s1234_s4] ss:$0 sm:$0xff]  ;;  %p957_p3 = por %p956_p2, %p955_p1 }
  0x3e   :  { %873 = vmatpush3.bf16.msra.mxu1 %v943_v1 }
  0x3f   :  { %846 = vmatpush3.bf16.msra.mxu0 %v940_v61  ;;  %874 = vmatprep.subr.bf16.mxu1 %v974_v44  ;;  %p958_p4 = pnand %p957_p3, %p951_p0 }
  0x42   :  { %552 = vmatmul.mubr.bf16.vlgmr.msra.gmra.mrb[4].mxu0 %v33_v63  ;;  %875 = vmatpush3.bf16.msra.mxu1 %v944_v2 }
  0x43   :  { %876 = vmatprep.subr.bf16.mxu1 %v974_v44 }
  0x46   :  { %877 = vmatpush3.bf16.msra.mxu1 %v945_v3 }
  0x47   :  { %878 = vmatprep.subr.bf16.mxu1 %v974_v44 }
  0x4a   :  { %879 = vmatpush3.bf16.msra.mxu1 %v946_v4 }
  0x4b   :  { %880 = vmatprep.subr.bf16.mxu1 %v974_v44 }
  0x4e   :  { %881 = vmatpush3.bf16.msra.mxu1 %v947_v5 }
  0x4f   :  { %882 = vmatprep.subr.bf16.mxu1 %v974_v44 }
  0x52   :  { %883 = vmatpush3.bf16.msra.mxu1 %v948_v6 }
  0x53   :  { %884 = vmatprep.subr.bf16.mxu1 %v974_v44 }
  0x56   :  { %885 = vmatpush3.bf16.msra.mxu1 %v949_v7 }
  0xf5   :  { %v803_v8 = vpop.f32.mrb[0].mxu0 }
  0xf6   :  { %v804_v10 = vpop.f32.mrb[1].mxu0 }
  0xf7   :  { %v805_v11 = vadd.f32 %v804_v10, %v803_v8  ;;  %v806_v12 = vpop.f32.mrb[2].mxu0  ;;  %v825_v13 = vpop.f32.mrb[0].mxu1 }
  0xf8   :  { %v807_v14 = vpop.f32.mrb[3].mxu0  ;;  %v826_v16 = vpop.f32.mrb[1].mxu1 }
  0xf9   :  { %v474_v15 = vadd.f32 %v805_v11, %v727_v9  ;;  %v827_v17 = vadd.f32 %v826_v16, %v825_v13  ;;  %v828_v18 = vpop.f32.mrb[2].mxu1 }
  0xfa   :  { %v829_v19 = vpop.f32.mrb[3].mxu1 }
  0xfb   :  { %v514_v20 = vadd.f32 %v827_v17, %v474_v15 }
  0xff   :  { %v593_v21 = vpop.f32.mrb[4].mxu1 }
 0x100   :  { %v868_v22 = vpop.f32.mrb[5].mxu1 }
 0x101   :  { %v596_v23 = vpop.f32.mrb[6].mxu1 }
 0x102   :  { %v869_v24 = vpop.f32.mrb[7].mxu1 }
 0x115   :  { %v847_v25 = vpop.f32.mrb[4].mxu0 }
 0x116   :  { %v848_v26 = vpop.f32.mrb[5].mxu0 }
 0x117   :  { %v849_v27 = vadd.f32 %v848_v26, %v847_v25  ;;  %v850_v28 = vpop.f32.mrb[6].mxu0 }
 0x118   :  { %v851_v29 = vpop.f32.mrb[7].mxu0 }
 0x119   :  { %v554_v30 = vadd.f32 %v849_v27, %v514_v20 }
 0x11b   :  { %v594_v31 = vadd.f32 %v593_v21, %v554_v30 }
 0x11d   :  { %v599_v32 = vmax.f32 %v594_v31, 0.0 }
 0x11f   :  { %v600_v33 = vpack.c.bf16 %v599_v32, %v599_v32 }
 0x121   :  { %887 = vmatmul.mubr.bf16.vlgmr.msra.gmra.mrb[8].mxu1 %v600_v33 }
 0x1f4   :  { %v706_v35 = vpop.f32.mrb[8].mxu1 }
 0x1f5   :  { %v707_v36 = vadd.f32 %v778_v34, %v706_v35  ;;  %v888_v37 = vpop.f32.mrb[9].mxu1 }
 0x1f6   :  { %v709_v38 = vpop.f32.mrb[10].mxu1 }
 0x1f7   :  { %712 = vst [vmem:[#allocation2] sm:$0xff] %v707_v36  ;;  %v889_v39 = vpop.f32.mrb[11].mxu1 }
 0x1f8   :  { %961 = shalt.err (!%p958_p4)
}
 0x1f9   :  { %s962_s4 = scalar_lea.hbm %s1235_s5, 128 }
 0x1fa   :  { %p963_p5 = scmp.ne.s32.totalorder %s1235_s5, %s962_s4  ;;  %p966_p6 = scmp.lt.u32.totalorder %s962_s4, %s1235_s5 }
 0x1fc   :  { %p968_p7 = pnand %p966_p6, %p963_p5 }
 0x1fe   :  { %971 = shalt.err (!%p968_p7)
}
 0x1ff   :  { %722 = dma.vmem_to_hbm [thread:$0]  %s720_s22, 128, %s1235_s5, [#allocation3]  }
 0x200   :  { %972 = dma.done.wait [#allocation3], 128  }
 0x201   :  { %973 = vsyncadd [#allocation3], 4294967168 }
 0x202   :  { %726 = vsyncpa [#allocation3], 1 }

</bundles_post_ra>
